<compile_context>
chip_gen: v7x
topology: tpu7x:2x2x1
jax: 0.10.0
libtpu: 0.0.40
codegen_flags: <defaults>
</compile_context>

<pallas_src>
import functools
import math

import jax
import jax.numpy as jnp
from jax import lax
from jax.experimental import pallas as pl
from jax.experimental.pallas import tpu as pltpu

_LN_EPS = 1e-5


def _vrnn_kernel(x_ref, s_ref, w_ref, m_ref, b_ref, g_ref, beta_ref, o_ref):
    # x_ref/s_ref/o_ref: (tile, LANES) lane-dense slabs, LANES = PACK * F.
    # w_ref: (LANES, LANES) block-diagonal replication of W^T.
    # m_ref: (LANES, LANES) block-diagonal per-group averaging matrix (1/F).
    # b/g/beta: (1, LANES) bias / LN affine, tiled PACK times.
    x = x_ref[...].astype(jnp.float32)
    s = s_ref[...].astype(jnp.float32)

    # Linear: (tensor + state) @ W^T + b  (block-diag W^T handles every group).
    h = jnp.dot(x + s, w_ref[...], preferred_element_type=jnp.float32)
    h = h + b_ref[...]

    # Activation (ReLU).  Dropout: eval mode -> identity.
    h = jnp.maximum(h, 0.0)

    # Residual + LayerNorm over each F-wide feature group.  The two group
    # statistics are *independent* block-diagonal matmuls on y (pipeline
    # back-to-back on the MXU); var = E[y^2] - mean^2, clamped at 0.
    y = h + x
    mean = jnp.dot(y, m_ref[...], preferred_element_type=jnp.float32)
    ey2 = jnp.dot(y * y, m_ref[...], preferred_element_type=jnp.float32)
    var = jnp.maximum(ey2 - mean * mean, 0.0)
    out = (y - mean) * lax.rsqrt(var + _LN_EPS) * g_ref[...] + beta_ref[...]

    o_ref[...] = out.astype(o_ref.dtype)


def _round_up(x, m):
    return (x + m - 1) // m * m


def make_vrnn_params(weight, bias, ln_gamma, ln_beta):
    """Build the lane-packed constant operands once per weight set.

    weight: [F, F] in PyTorch [out, in] layout; bias/ln_gamma/ln_beta: [F].
    Returns a tuple of arrays consumed by vrnn_forward.
    """
    F = weight.shape[0]
    pack = (128 // F) if (F <= 128 and 128 % F == 0) else 1
    lanes = F * pack
    f32 = jnp.float32
    eye = jnp.eye(pack, dtype=f32)
    w_bd = jnp.kron(eye, weight.T.astype(f32))                    # block-diag W^T
    m_bd = jnp.kron(eye, jnp.full((F, F), 1.0 / F, dtype=f32))    # group-mean mat
    b_t = jnp.tile(bias.astype(f32), pack).reshape(1, lanes)
    g_t = jnp.tile(ln_gamma.astype(f32), pack).reshape(1, lanes)
    beta_t = jnp.tile(ln_beta.astype(f32), pack).reshape(1, lanes)
    return (w_bd, m_bd, b_t, g_t, beta_t)


@functools.partial(jax.jit, static_argnames=("tile_rows",))
def vrnn_forward(tensor, state, params, tile_rows=2048):
    """tensor/state: [B, T, F]; params from make_vrnn_params.

    tile_rows = packed (128-lane) rows per grid step; rounded to a multiple
    of 8. Sweep 512-4096 on real shapes.
    """
    w_bd, m_bd, b_t, g_t, beta_t = params
    B, T, F = tensor.shape
    lanes = w_bd.shape[0]
    assert lanes % F == 0, "params were built for a different feature dim"
    pack = lanes // F
    rows = B * T

    x2d = tensor.reshape(rows, F)
    s2d = state.reshape(rows, F)
    # Only pad up to the 128-lane packing granularity (<= pack-1 rows), and
    # only when needed.  The per-tile tail is handled by Pallas's masked
    # boundary blocks instead of wrapper-side padding.
    rem = rows % pack
    if rem:
        pad = pack - rem
        x2d = jnp.pad(x2d, ((0, pad), (0, 0)))
        s2d = jnp.pad(s2d, ((0, pad), (0, 0)))
    packed_rows = x2d.shape[0] // pack
    xp = x2d.reshape(packed_rows, lanes)   # free: row-major contiguous
    sp = s2d.reshape(packed_rows, lanes)

    # Tile selection: multiple of 8 sublanes; >= 2 grid steps when there is
    # enough work so both v7x TensorCores get a share of the "parallel" axis.
    tile_rows = max(8, _round_up(tile_rows, 8))
    if packed_rows <= 8:
        tile = packed_rows                       # single block == full array dim
    elif packed_rows <= 2 * tile_rows:
        tile = min(tile_rows, _round_up(pl.cdiv(packed_rows, 2), 8))
    else:
        tile = tile_rows
    grid = (pl.cdiv(packed_rows, tile),)

    itemsize = jnp.dtype(tensor.dtype).itemsize
    cost = pl.CostEstimate(
        flops=6 * packed_rows * lanes * lanes,            # 3 matmuls
        transcendentals=packed_rows * lanes,              # rsqrt
        bytes_accessed=3 * packed_rows * lanes * itemsize
        + (2 * lanes * lanes + 3 * lanes) * 4,
    )

    # VMEM budget: 3 streamed arrays x 2 buffers x tile x lanes, plus the
    # double-buffered constants; explicit limit with headroom keeps tile
    # sweeps from silently OOM-ing on v7x's smaller VMEM.
    stream_bytes = 3 * 2 * tile * lanes * itemsize
    const_bytes = 2 * (2 * lanes * lanes + 3 * lanes) * 4
    vmem_limit = min(96 * 1024 * 1024,
                     max(32 * 1024 * 1024, (stream_bytes + const_bytes) * 2))

    out_p = pl.pallas_call(
        _vrnn_kernel,
        out_shape=jax.ShapeDtypeStruct((packed_rows, lanes), tensor.dtype),
        grid_spec=pltpu.PrefetchScalarGridSpec(
            num_scalar_prefetch=0,
            grid=grid,
            in_specs=[
                pl.BlockSpec((tile, lanes), lambda i: (i, 0)),    # tensor
                pl.BlockSpec((tile, lanes), lambda i: (i, 0)),    # state
                pl.BlockSpec((lanes, lanes), lambda i: (0, 0)),   # block-diag W^T
                pl.BlockSpec((lanes, lanes), lambda i: (0, 0)),   # group-mean mat
                pl.BlockSpec((1, lanes), lambda i: (0, 0)),       # bias
                pl.BlockSpec((1, lanes), lambda i: (0, 0)),       # ln gamma
                pl.BlockSpec((1, lanes), lambda i: (0, 0)),       # ln beta
            ],
            out_specs=pl.BlockSpec((tile, lanes), lambda i: (i, 0)),
        ),
        compiler_params=pltpu.CompilerParams(
            dimension_semantics=("parallel",),
            vmem_limit_bytes=int(vmem_limit),
        ),
        cost_estimate=cost,
    )(xp, sp, w_bd, m_bd, b_t, g_t, beta_t)

    out2d = out_p.reshape(packed_rows * pack, F)[:rows]
    return out2d.reshape(B, T, F)


def _reference(tensor, state, weight, bias, ln_gamma, ln_beta):
    x = (tensor + state) @ weight.T + bias
    x = jnp.maximum(x, 0.0)
    y = x + tensor
    mean = jnp.mean(y, axis=-1, keepdims=True)
    var = jnp.mean((y - mean) ** 2, axis=-1, keepdims=True)
    y = (y - mean) / jnp.sqrt(var + 1e-5)
    return y * ln_gamma + ln_beta


if __name__ == "__main__":
    F = 32  # input_dim

    key = jax.random.PRNGKey(0)
    k_w, k_b, k_x1, k_s1, k_x2, k_s2, k_x3, k_s3 = jax.random.split(key, 8)

    # Deterministic parameters (mimics nn.Linear uniform(-1/sqrt(F), 1/sqrt(F)))
    bound = 1.0 / math.sqrt(F)
    weight = jax.random.uniform(k_w, (F, F), minval=-bound, maxval=bound,
                                dtype=jnp.float32)  # [out, in]
    bias = jax.random.uniform(k_b, (F,), minval=-bound, maxval=bound,
                              dtype=jnp.float32)
    ln_gamma = jnp.ones((F,), dtype=jnp.float32)
    ln_beta = jnp.zeros((F,), dtype=jnp.float32)

    # Constants built once per weight set (hoisted out of the per-call jit).
    params = make_vrnn_params(weight, bias, ln_gamma, ln_beta)

    def _check(B, T, kx, ks):
        t = jax.random.normal(kx, (B, T, F), dtype=jnp.float32)
        s = jax.random.normal(ks, (B, T, F), dtype=jnp.float32)
        out = jax.block_until_ready(vrnn_forward(t, s, params))
        ref = _reference(t, s, weight, bias, ln_gamma, ln_beta)
        assert out.shape == (B, T, F)
        assert jnp.allclose(out, ref, atol=2e-5, rtol=2e-5), (
            float(jnp.max(jnp.abs(out - ref))))

    # Case 1: small, evenly packed shape (single full-dim block).
    _check(2, 8, k_x1, k_s1)
    # Case 2: ragged B*T (exercises the <= pack-1 row packing pad).
    _check(3, 7, k_x2, k_s2)
    # Case 3: multi-step grid with a ragged (masked) last tile.
    _check(4, 40, k_x3, k_s3)

    print("KERNEL_OK")
</pallas_src>

<mosaic_0001>
module attributes {stable_mosaic.version = 11 : i64} {
  func.func @_vrnn_kernel(%arg0: i32, %arg1: memref<4x128xf32, #tpu.memory_space<vmem>>, %arg2: memref<4x128xf32, #tpu.memory_space<vmem>>, %arg3: memref<128x128xf32, #tpu.memory_space<vmem>>, %arg4: memref<128x128xf32, #tpu.memory_space<vmem>>, %arg5: memref<1x128xf32, #tpu.memory_space<vmem>>, %arg6: memref<1x128xf32, #tpu.memory_space<vmem>>, %arg7: memref<1x128xf32, #tpu.memory_space<vmem>>, %arg8: memref<4x128xf32, #tpu.memory_space<vmem>>) attributes {dimension_semantics = [#tpu.dimension_semantics<parallel>], iteration_bounds = array<i64: 1>, scalar_prefetch = 0 : i64, scratch_operands = 0 : i64, tpu.core_type = #tpu.core_type<tc>, window_params = [{transform_indices = @transform_0, window_bounds = array<i64: 4, 128>}, {transform_indices = @transform_1, window_bounds = array<i64: 4, 128>}, {pipeline_mode = #tpu.pipeline_mode<synchronous>, transform_indices = @transform_2, window_bounds = array<i64: 128, 128>}, {pipeline_mode = #tpu.pipeline_mode<synchronous>, transform_indices = @transform_3, window_bounds = array<i64: 128, 128>}, {pipeline_mode = #tpu.pipeline_mode<synchronous>, transform_indices = @transform_4, window_bounds = array<i64: 1, 128>}, {pipeline_mode = #tpu.pipeline_mode<synchronous>, transform_indices = @transform_5, window_bounds = array<i64: 1, 128>}, {pipeline_mode = #tpu.pipeline_mode<synchronous>, transform_indices = @transform_6, window_bounds = array<i64: 1, 128>}, {transform_indices = @transform_7, window_bounds = array<i64: 4, 128>}]} {
    %c0 = arith.constant 0 : index
    %c0_0 = arith.constant 0 : index
    %0 = vector.load %arg1[%c0, %c0_0] : memref<4x128xf32, #tpu.memory_space<vmem>>, vector<4x128xf32>
    %c0_1 = arith.constant 0 : index
    %c0_2 = arith.constant 0 : index
    %1 = vector.load %arg2[%c0_1, %c0_2] : memref<4x128xf32, #tpu.memory_space<vmem>>, vector<4x128xf32>
    %2 = arith.addf %0, %1 : vector<4x128xf32>
    %c0_3 = arith.constant 0 : index
    %c0_4 = arith.constant 0 : index
    %3 = vector.load %arg3[%c0_3, %c0_4] : memref<128x128xf32, #tpu.memory_space<vmem>>, vector<128x128xf32>
    %cst = arith.constant dense<0.000000e+00> : vector<4x128xf32>
    %4 = tpu.matmul %2, %3, %cst {dimension_numbers = #tpu.dot_dimension_numbers<[1], [0], [0], [1], [0, 0, 1, 1], [], []>} : vector<4x128xf32>, vector<128x128xf32>, vector<4x128xf32> -> vector<4x128xf32>
    %c0_5 = arith.constant 0 : index
    %c0_6 = arith.constant 0 : index
    %5 = vector.load %arg5[%c0_5, %c0_6] : memref<1x128xf32, #tpu.memory_space<vmem>>, vector<1x128xf32>
    %6 = vector.broadcast %5 : vector<1x128xf32> to vector<4x128xf32>
    %7 = arith.addf %4, %6 : vector<4x128xf32>
    %cst_7 = arith.constant 0.000000e+00 : f32
    %8 = vector.broadcast %cst_7 : f32 to vector<4x128xf32>
    %9 = arith.maximumf %7, %8 : vector<4x128xf32>
    %10 = arith.addf %9, %0 : vector<4x128xf32>
    %c0_8 = arith.constant 0 : index
    %c0_9 = arith.constant 0 : index
    %11 = vector.load %arg4[%c0_8, %c0_9] : memref<128x128xf32, #tpu.memory_space<vmem>>, vector<128x128xf32>
    %cst_10 = arith.constant dense<0.000000e+00> : vector<4x128xf32>
    %12 = tpu.matmul %10, %11, %cst_10 {dimension_numbers = #tpu.dot_dimension_numbers<[1], [0], [0], [1], [0, 0, 1, 1], [], []>} : vector<4x128xf32>, vector<128x128xf32>, vector<4x128xf32> -> vector<4x128xf32>
    %13 = arith.mulf %10, %10 : vector<4x128xf32>
    %c0_11 = arith.constant 0 : index
    %c0_12 = arith.constant 0 : index
    %14 = vector.load %arg4[%c0_11, %c0_12] : memref<128x128xf32, #tpu.memory_space<vmem>>, vector<128x128xf32>
    %cst_13 = arith.constant dense<0.000000e+00> : vector<4x128xf32>
    %15 = tpu.matmul %13, %14, %cst_13 {dimension_numbers = #tpu.dot_dimension_numbers<[1], [0], [0], [1], [0, 0, 1, 1], [], []>} : vector<4x128xf32>, vector<128x128xf32>, vector<4x128xf32> -> vector<4x128xf32>
    %16 = arith.mulf %12, %12 : vector<4x128xf32>
    %17 = arith.subf %15, %16 : vector<4x128xf32>
    %cst_14 = arith.constant 0.000000e+00 : f32
    %18 = vector.broadcast %cst_14 : f32 to vector<4x128xf32>
    %19 = arith.maximumf %17, %18 : vector<4x128xf32>
    %20 = arith.subf %10, %12 : vector<4x128xf32>
    %cst_15 = arith.constant 9.99999974E-6 : f32
    %21 = vector.broadcast %cst_15 : f32 to vector<4x128xf32>
    %22 = arith.addf %19, %21 : vector<4x128xf32>
    %23 = math.rsqrt %22 : vector<4x128xf32>
    %24 = arith.mulf %20, %23 : vector<4x128xf32>
    %c0_16 = arith.constant 0 : index
    %c0_17 = arith.constant 0 : index
    %25 = vector.load %arg6[%c0_16, %c0_17] : memref<1x128xf32, #tpu.memory_space<vmem>>, vector<1x128xf32>
    %26 = vector.broadcast %25 : vector<1x128xf32> to vector<4x128xf32>
    %27 = arith.mulf %24, %26 : vector<4x128xf32>
    %c0_18 = arith.constant 0 : index
    %c0_19 = arith.constant 0 : index
    %28 = vector.load %arg7[%c0_18, %c0_19] : memref<1x128xf32, #tpu.memory_space<vmem>>, vector<1x128xf32>
    %29 = vector.broadcast %28 : vector<1x128xf32> to vector<4x128xf32>
    %30 = arith.addf %27, %29 : vector<4x128xf32>
    %c0_20 = arith.constant 0 : index
    %c0_21 = arith.constant 0 : index
    %31 = vector.load %arg8[%c0_20, %c0_21] : memref<4x128xf32, #tpu.memory_space<vmem>>, vector<4x128xf32>
    tpu.vector_store %arg8[%c0_20, %c0_21], %30 {strides = array<i32>} : memref<4x128xf32, #tpu.memory_space<vmem>>, vector<4x128xf32>,
    return
  }
  func.func @transform_0(%arg0: i32) -> (i32, i32) {
    %c0_i32 = arith.constant 0 : i32
    %c0_i32_0 = arith.constant 0 : i32
    return %arg0, %c0_i32 : i32, i32
  }
  func.func @transform_1(%arg0: i32) -> (i32, i32) {
    %c0_i32 = arith.constant 0 : i32
    %c0_i32_0 = arith.constant 0 : i32
    return %arg0, %c0_i32 : i32, i32
  }
  func.func @transform_2(%arg0: i32) -> (i32, i32) {
    %c0_i32 = arith.constant 0 : i32
    %c0_i32_0 = arith.constant 0 : i32
    %c0_i32_1 = arith.constant 0 : i32
    return %c0_i32, %c0_i32_0 : i32, i32
  }
  func.func @transform_3(%arg0: i32) -> (i32, i32) {
    %c0_i32 = arith.constant 0 : i32
    %c0_i32_0 = arith.constant 0 : i32
    %c0_i32_1 = arith.constant 0 : i32
    return %c0_i32, %c0_i32_0 : i32, i32
  }
  func.func @transform_4(%arg0: i32) -> (i32, i32) {
    %c0_i32 = arith.constant 0 : i32
    %c0_i32_0 = arith.constant 0 : i32
    %c0_i32_1 = arith.constant 0 : i32
    return %c0_i32, %c0_i32_0 : i32, i32
  }
  func.func @transform_5(%arg0: i32) -> (i32, i32) {
    %c0_i32 = arith.constant 0 : i32
    %c0_i32_0 = arith.constant 0 : i32
    %c0_i32_1 = arith.constant 0 : i32
    return %c0_i32, %c0_i32_0 : i32, i32
  }
  func.func @transform_6(%arg0: i32) -> (i32, i32) {
    %c0_i32 = arith.constant 0 : i32
    %c0_i32_0 = arith.constant 0 : i32
    %c0_i32_1 = arith.constant 0 : i32
    return %c0_i32, %c0_i32_0 : i32, i32
  }
  func.func @transform_7(%arg0: i32) -> (i32, i32) {
    %c0_i32 = arith.constant 0 : i32
    %c0_i32_0 = arith.constant 0 : i32
    return %arg0, %c0_i32 : i32, i32
  }
}

</mosaic_0001>

<bundles_post_ra>
// kernel: vrnn_forward.1
= control target key start
LH: loop header
LB: loop body
LE: loop exit
PB: predicated region body
PF: predicated region fallthrough
CT: control target
= control target key end

     0   :  { %12 = vsyncpa [#allocation3], 0  ;;  %s746_s0 = inlined_call_operand.vmem [shape: f32[4,128], index: 0, kind: input, shape index: {}]   ;;  %s747_s1 = inlined_call_operand.vmem [shape: f32[4,128], index: 1, kind: input, shape index: {}]   ;;  %s748_s2 = inlined_call_operand.hbm [shape: f32[128,128], index: 2, kind: input, shape index: {}]   ;;  %s749_s3 = inlined_call_operand.hbm [shape: f32[128,128], index: 3, kind: input, shape index: {}]   ;;  %s750_s4 = inlined_call_operand.vmem [shape: f32[1,128], index: 4, kind: input, shape index: {}]   ;;  %s751_s5 = inlined_call_operand.vmem [shape: f32[1,128], index: 5, kind: input, shape index: {}]   ;;  %s752_s6 = inlined_call_operand.vmem [shape: f32[1,128], index: 6, kind: input, shape index: {}]   ;;  %s753_s7 = inlined_call_operand.vmem [shape: f32[4,128], index: 7, kind: output, shape index: {}]  }
   0x1   :  { %13 = vsyncpa [#allocation5], 0  ;;  %s627_s24 = smov [#allocation2]   ;;  %s579_s28 = scalar_lea.hbm %s748_s2, 2048 }
   0x2   :  { %s23_s25 = sshll.u32 %s627_s24, 4  ;;  %p580_p0 = scmp.ne.s32.totalorder %s748_s2, %s579_s28  ;;  %s24_s25 = int_to_ptr.vmem [resolvable:$true] %s23_s25 }
   0x3   :  { %p583_p1 = scmp.lt.u32.totalorder %s579_s28, %s748_s2 }
   0x5   :  { %p585_p2 = pnand %p583_p1, %p580_p0 }
   0x7   :  { %588 = shalt.err (!%p585_p2)
}
   0x8   :  { %s589_s10 = scalar_lea.vmem %s24_s25, 2048  ;;  %p594_p4 = scmp.lt.s32.totalorder %s24_s25, %s24_s25 }
   0x9   :  { %p590_p3 = scmp.ne.s32.totalorder %s24_s25, %s589_s10  ;;  %p595_p5 = scmp.lt.s32.totalorder %s589_s10, %s589_s10 }
   0xb   :  { %p596_p6 = por %p595_p5, %p594_p4 }
   0xd   :  { %p597_p7 = pnand %p596_p6, %p590_p3 }
   0xf   :  { %600 = shalt.err (!%p597_p7)
}
  0x10   :  { %s628_s11 = smov 128   ;;  %s629_s12 = smov 8  }
  0x11   :  { %29 = dma.hbm_to_vmem [thread:$0]  %s748_s2, 2048, %s24_s25, [#allocation3], %s628_s11, %s628_s11, %s629_s12  }
  0x12   :  { %s630_s15 = smov [#allocation4]   ;;  %s601_s19 = scalar_lea.hbm %s749_s3, 2048 }
  0x13   :  { %s35_s16 = sshll.u32 %s630_s15, 4  ;;  %p602_p8 = scmp.ne.s32.totalorder %s749_s3, %s601_s19  ;;  %s36_s16 = int_to_ptr.vmem [resolvable:$true] %s35_s16 }
  0x14   :  { %p605_p9 = scmp.lt.u32.totalorder %s601_s19, %s749_s3 }
  0x16   :  { %p607_p10 = pnand %p605_p9, %p602_p8 }
  0x18   :  { %610 = shalt.err (!%p607_p10)
}
  0x19   :  { %s611_s24 = scalar_lea.vmem %s36_s16, 2048  ;;  %p616_p12 = scmp.lt.s32.totalorder %s36_s16, %s36_s16 }
  0x1a   :  { %p612_p11 = scmp.ne.s32.totalorder %s36_s16, %s611_s24  ;;  %p617_p13 = scmp.lt.s32.totalorder %s611_s24, %s611_s24 }
  0x1c   :  { %p618_p0 = por %p617_p13, %p616_p12 }
  0x1e   :  { %p619_p1 = pnand %p618_p0, %p612_p11 }
  0x20   :  { %622 = shalt.err (!%p619_p1)
}
  0x21   :  { %41 = dma.hbm_to_vmem [thread:$0]  %s749_s3, 2048, %s36_s16, [#allocation5], %s628_s11, %s628_s11, %s629_s12  }
  0x22   :  { %623 = dma.done.wait [#allocation3], 2048  }
  0x23   :  { %624 = vsyncadd [#allocation3], 4294965248 }
  0x24   :  { %625 = dma.done.wait [#allocation5], 2048  }
  0x25   :  { %626 = vsyncadd [#allocation5], 4294965248  ;;  %v631_v0 = vmov 0.0|0.0   ;;  %vm632_vm0 = vmmov 0   ;;  %v633_v1 = vmov 0.0   ;;  %v57_v2 = vld [vmem:[#allocation2] sm:$0xff] }
  0x26   :  { %498 = vmatprep.subr.bf16.mxu0 %v631_v0  ;;  %425 = vmatprep.mubr.msk.f32.mxu0 %vm632_vm0, %v633_v1  ;;  %v58_v3 = vld [vmem:[#allocation2 + $0x8] sm:$0xff]  ;;  %v59_v4 = vld [vmem:[#allocation2 + $0x10] sm:$0xff]  ;;  %v60_v6 = vld [vmem:[#allocation2 + $0x18] sm:$0xff] }
  0x27   :  { %522 = vmatprep.subr.bf16.mxu1 %v631_v0  ;;  %460 = vmatprep.mubr.msk.f32.mxu1 %vm632_vm0, %v633_v1  ;;  %v499_v5 = vpack.c.bf16 %v58_v3, %v57_v2  ;;  %v502_v7 = vpack.c.bf16 %v60_v6, %v59_v4  ;;  %v61_v8 = vld [vmem:[#allocation2 + $0x20] sm:$0xff]  ;;  %v62_v9 = vld [vmem:[#allocation2 + $0x28] sm:$0xff]  ;;  %v154_v12 = vld [vmem:[#allocation4 + $0x10] sm:$0xff] }
  0x28   :  { %v152_v10 = vld [vmem:[#allocation4] sm:$0xff]  ;;  %v153_v11 = vld [vmem:[#allocation4 + $0x8] sm:$0xff]  ;;  %v505_v13 = vpack.c.bf16 %v62_v9, %v61_v8  ;;  %v155_v15 = vld [vmem:[#allocation4 + $0x18] sm:$0xff] }
  0x29   :  { %500 = vmatpush3.bf16.msra.mxu0 %v499_v5  ;;  %v523_v14 = vpack.c.bf16 %v153_v11, %v152_v10  ;;  %v63_v16 = vld [vmem:[#allocation2 + $0x30] sm:$0xff]  ;;  %v64_v17 = vld [vmem:[#allocation2 + $0x38] sm:$0xff]  ;;  %v526_v18 = vpack.c.bf16 %v155_v15, %v154_v12  ;;  %v156_v19 = vld [vmem:[#allocation4 + $0x20] sm:$0xff] }
  0x2a   :  { %501 = vmatprep.subr.bf16.mxu0 %v631_v0  ;;  %v157_v20 = vld [vmem:[#allocation4 + $0x28] sm:$0xff]  ;;  %v508_v21 = vpack.c.bf16 %v64_v17, %v63_v16  ;;  %v65_v22 = vld [vmem:[#allocation2 + $0x40] sm:$0xff]  ;;  %v158_v25 = vld [vmem:[#allocation4 + $0x30] sm:$0xff] }
  0x2b   :  { %524 = vmatpush3.bf16.msra.mxu1 %v523_v14  ;;  %v66_v23 = vld [vmem:[#allocation2 + $0x48] sm:$0xff]  ;;  %v529_v24 = vpack.c.bf16 %v157_v20, %v156_v19  ;;  %v159_v26 = vld [vmem:[#allocation4 + $0x38] sm:$0xff]  ;;  %v67_v28 = vld [vmem:[#allocation2 + $0x50] sm:$0xff] }
  0x2c   :  { %525 = vmatprep.subr.bf16.mxu1 %v631_v0  ;;  %v511_v27 = vpack.c.bf16 %v66_v23, %v65_v22  ;;  %v68_v29 = vld [vmem:[#allocation2 + $0x58] sm:$0xff]  ;;  %v532_v30 = vpack.c.bf16 %v159_v26, %v158_v25  ;;  %v160_v31 = vld [vmem:[#allocation4 + $0x40] sm:$0xff]  ;;  %v161_v32 = vld [vmem:[#allocation4 + $0x48] sm:$0xff] }
  0x2d   :  { %503 = vmatpush3.bf16.msra.mxu0 %v502_v7  ;;  %v514_v33 = vpack.c.bf16 %v68_v29, %v67_v28  ;;  %v69_v34 = vld [vmem:[#allocation2 + $0x60] sm:$0xff]  ;;  %v70_v35 = vld [vmem:[#allocation2 + $0x68] sm:$0xff]  ;;  %v535_v36 = vpack.c.bf16 %v161_v32, %v160_v31  ;;  %v162_v37 = vld [vmem:[#allocation4 + $0x50] sm:$0xff] }
  0x2e   :  { %504 = vmatprep.subr.bf16.mxu0 %v631_v0  ;;  %v163_v38 = vld [vmem:[#allocation4 + $0x58] sm:$0xff]  ;;  %v517_v39 = vpack.c.bf16 %v70_v35, %v69_v34  ;;  %v71_v40 = vld [vmem:[#allocation2 + $0x70] sm:$0xff]  ;;  %v54_v44 = vld [vmem:[%s746_s0] sm:$0xf] }
  0x2f   :  { %527 = vmatpush3.bf16.msra.mxu1 %v526_v18  ;;  %v72_v41 = vld [vmem:[#allocation2 + $0x78] sm:$0xff]  ;;  %v538_v42 = vpack.c.bf16 %v163_v38, %v162_v37  ;;  %v55_v45 = vld [vmem:[%s747_s1] sm:$0xf]  ;;  %v165_v48 = vld [vmem:[#allocation4 + $0x68] sm:$0xff] }
  0x30   :  { %528 = vmatprep.subr.bf16.mxu1 %v631_v0  ;;  %v520_v43 = vpack.c.bf16 %v72_v41, %v71_v40  ;;  %v56_v46 = vadd.f32 %v55_v45, %v54_v44  ;;  %v164_v47 = vld [vmem:[#allocation4 + $0x60] sm:$0xff]  ;;  %v166_v50 = vld [vmem:[#allocation4 + $0x70] sm:$0xff]  ;;  %v167_v51 = vld [vmem:[#allocation4 + $0x78] sm:$0xff] }
  0x31   :  { %506 = vmatpush3.bf16.msra.mxu0 %v505_v13  ;;  %v541_v49 = vpack.c.bf16 %v165_v48, %v164_v47  ;;  %v544_v52 = vpack.c.bf16 %v167_v51, %v166_v50  ;;  %v339_v53 = vld [vmem:[%s750_s4] ss:$0 sm:$0xff] }
  0x32   :  { %507 = vmatprep.subr.bf16.mxu0 %v631_v0  ;;  %v340_v6 = vld [vmem:[%s751_s5] ss:$0 sm:$0xff] }
  0x33   :  { %530 = vmatpush3.bf16.msra.mxu1 %v529_v24  ;;  %v341_v8 = vld [vmem:[%s752_s6] ss:$0 sm:$0xff] }
  0x34   :  { %531 = vmatprep.subr.bf16.mxu1 %v631_v0 }
  0x35   :  { %509 = vmatpush3.bf16.msra.mxu0 %v508_v21 }
  0x36   :  { %510 = vmatprep.subr.bf16.mxu0 %v631_v0 }
  0x37   :  { %533 = vmatpush3.bf16.msra.mxu1 %v532_v30 }
  0x38   :  { %534 = vmatprep.subr.bf16.mxu1 %v631_v0 }
  0x39   :  { %512 = vmatpush3.bf16.msra.mxu0 %v511_v27 }
  0x3a   :  { %513 = vmatprep.subr.bf16.mxu0 %v631_v0 }
  0x3b   :  { %536 = vmatpush3.bf16.msra.mxu1 %v535_v36 }
  0x3c   :  { %537 = vmatprep.subr.bf16.mxu1 %v631_v0 }
  0x3d   :  { %515 = vmatpush3.bf16.msra.mxu0 %v514_v33 }
  0x3e   :  { %516 = vmatprep.subr.bf16.mxu0 %v631_v0 }
  0x3f   :  { %539 = vmatpush3.bf16.msra.mxu1 %v538_v42 }
  0x40   :  { %540 = vmatprep.subr.bf16.mxu1 %v631_v0 }
  0x41   :  { %518 = vmatpush3.bf16.msra.mxu0 %v517_v39 }
  0x42   :  { %519 = vmatprep.subr.bf16.mxu0 %v631_v0 }
  0x43   :  { %542 = vmatpush3.bf16.msra.mxu1 %v541_v49 }
  0x44   :  { %543 = vmatprep.subr.bf16.mxu1 %v631_v0 }
  0x45   :  { %521 = vmatpush3.bf16.msra.mxu0 %v520_v43 }
  0x46   :  { %546 = vmatprep.subr.bf16.mxu0 %v631_v0 }
  0x47   :  { %545 = vmatpush3.bf16.msra.mxu1 %v544_v52 }
  0x48   :  { %426 = vmatmul.mubr.f32.vlgmr.msra.gmra.mrb[0].mxu0 %v56_v46 }
  0x49   :  { %548 = vmatpush3.bf16.msra.mxu0 %v523_v14  ;;  %495 = vmatprep.mubr.msk.f32.mxu0 %vm632_vm0, %v633_v1 }
  0x4a   :  { %549 = vmatprep.subr.bf16.mxu0 %v631_v0 }
  0x4d   :  { %551 = vmatpush3.bf16.msra.mxu0 %v526_v18 }
  0x4e   :  { %552 = vmatprep.subr.bf16.mxu0 %v631_v0 }
  0x51   :  { %554 = vmatpush3.bf16.msra.mxu0 %v529_v24 }
  0x52   :  { %555 = vmatprep.subr.bf16.mxu0 %v631_v0 }
  0x55   :  { %557 = vmatpush3.bf16.msra.mxu0 %v532_v30 }
  0x56   :  { %558 = vmatprep.subr.bf16.mxu0 %v631_v0 }
  0x59   :  { %560 = vmatpush3.bf16.msra.mxu0 %v535_v36 }
  0x5a   :  { %561 = vmatprep.subr.bf16.mxu0 %v631_v0 }
  0x5d   :  { %563 = vmatpush3.bf16.msra.mxu0 %v538_v42 }
  0x5e   :  { %564 = vmatprep.subr.bf16.mxu0 %v631_v0 }
  0x61   :  { %566 = vmatpush3.bf16.msra.mxu0 %v541_v49 }
  0x62   :  { %567 = vmatprep.subr.bf16.mxu0 %v631_v0 }
  0x65   :  { %569 = vmatpush3.bf16.msra.mxu0 %v544_v52 }
 0x11b   :  { %v146_v54 = vpop.f32.mrb[0].mxu0 }
 0x11c   :  { %v147_v55 = vadd.f32 %v339_v53, %v146_v54  ;;  %v427_v56 = vpop.f32.mrb[1].mxu0 }
 0x11e   :  { %v150_v57 = vmax.f32 %v147_v55, 0.0 }
 0x120   :  { %v151_v58 = vadd.f32 %v150_v57, %v54_v44 }
 0x122   :  { %461 = vmatmul.mubr.f32.vlgmr.msra.gmra.mrb[0].mxu1 %v151_v58  ;;  %v238_v59 = vmul.f32 %v151_v58, %v151_v58 }
 0x124   :  { %496 = vmatmul.mubr.f32.vlgmr.msra.gmra.mrb[2].mxu0 %v238_v59 }
 0x1f5   :  { %v234_v60 = vpop.f32.mrb[0].mxu1 }
 0x1f6   :  { %v309_v61 = vmul.f32 %v234_v60, %v234_v60  ;;  %v462_v62 = vpop.f32.mrb[1].mxu1  ;;  %v312_v4 = vsub.f32 %v151_v58, %v234_v60 }
 0x1f7   :  { %v305_v63 = vpop.f32.mrb[2].mxu0 }
 0x1f8   :  { %v310_v0 = vsub.f32 %v305_v63, %v309_v61  ;;  %v497_v1 = vpop.f32.mrb[3].mxu0 }
 0x1fa   :  { %v311_v2 = vmax.f32 %v310_v0, 0.0 }
 0x1fc   :  { %v313_v3 = vadd.f32 1e-05, %v311_v2 }
 0x1fe   :  { %577 = vrsqrt.f32 %v313_v3 }
 0x208   :  { %v578_v5 = vpop.eup %577 }
 0x209   :  { %v315_v7 = vmul.f32 %v578_v5, %v312_v4 }
 0x20b   :  { %v323_v9 = vmul.f32 %v340_v6, %v315_v7 }
 0x20d   :  { %v331_v10 = vadd.f32 %v341_v8, %v323_v9 }
 0x20f   :  { %332 = vst [vmem:[%s753_s7] sm:$0xf] %v331_v10 }
 0x210   :  { %337 = vsyncpa [#allocation3], 1 }
 0x211   :  { %338 = vsyncpa [#allocation5], 1 }

</bundles_post_ra>
